<compile_context>
chip_gen: v5e
topology: v5e:2x2
jax: 0.10.0
libtpu: 0.0.40
codegen_flags: <defaults>
</compile_context>

<pallas_src>
import functools

import jax
import jax.numpy as jnp
from jax.experimental import pallas as pl
from jax.experimental.pallas import tpu as pltpu


_VMEM_LIMIT = 32 * 1024 * 1024          # explicit scoped-VMEM request (safe on all gens)
_FUSED_BUDGET = 20 * 1024 * 1024        # budget for the VMEM-resident fused path
_STREAM_BUDGET = 20 * 1024 * 1024       # budget for streaming tiles


# ----------------------------------------------------------------------------
# helpers
# ----------------------------------------------------------------------------

def fold_bn(gamma, beta, mean, var, eps=1e-5):
    scale = gamma / jnp.sqrt(var + eps)
    shift = beta - mean * scale
    return scale, shift


def _pick_hw_tile(hw, target):
    """Largest multiple of 128 that divides `hw` and is <= target (>=128)."""
    best = 128
    k = 128
    limit = min(hw, max(128, target))
    while k <= limit:
        if hw % k == 0:
            best = k
        k += 128
    return best


def _attention_w1(s, fcwT, fcs, fcb, w1w, w1b, w2w, w2b):
    """Tiny per-batch chain: pooled (C,1) -> w1 (C,1).

    Implemented with broadcast-multiply-reduce so column/row forms alternate
    naturally (no transposes, no degenerate matvecs):
      s (C,1) -> z (1,mid) -> a,b (C,1) -> softmax over the 2 branches.
    """
    z = jnp.sum(fcwT * s, axis=0, keepdims=True)                 # (1, mid)
    z = jnp.maximum(z * fcs + fcb, 0.0)                          # BN + ReLU
    a = jnp.sum(w1w * z, axis=1, keepdims=True) + w1b            # (C, 1)
    b = jnp.sum(w2w * z, axis=1, keepdims=True) + w2b            # (C, 1)
    m = jnp.maximum(a, b)
    ea = jnp.exp(a - m)
    eb = jnp.exp(b - m)
    return ea / (ea + eb)                                        # (C, 1)


# ----------------------------------------------------------------------------
# Fused single-pass kernel: whole (C, HW) slab resident in VMEM per batch
# ----------------------------------------------------------------------------

def _sk_fused_kernel(f1_ref, f2_ref, fcwT_ref, fcs_ref, fcb_ref,
                     w1w_ref, w1b_ref, w2w_ref, w2b_ref,
                     coutw_ref, coutb_ref, o_ref, *, inv_hw):
    x1 = f1_ref[0].astype(jnp.float32)                           # (C, HW)
    x2 = f2_ref[0].astype(jnp.float32)
    # global average pool of (feat1 + feat2): lane-axis reduce
    s = jnp.sum(x1 + x2, axis=-1, keepdims=True) * inv_hw        # (C, 1)
    w1 = _attention_w1(s, fcwT_ref[...], fcs_ref[...], fcb_ref[...],
                       w1w_ref[...], w1b_ref[...], w2w_ref[...], w2b_ref[...])
    # blend with w1 only (w1 + w2 == 1): per-channel sublane broadcast
    blended = x2 + (x1 - x2) * w1                                # (C, HW)
    # 1x1 conv_out with BN scale folded into the weight, + shift + ReLU
    y = jnp.dot(coutw_ref[...], blended, preferred_element_type=jnp.float32)
    o_ref[0] = jnp.maximum(y + coutb_ref[...], 0.0).astype(o_ref.dtype)


def _sk_fused_call(f1, f2, fcwT, fcs, fcb, w1w, w1b, w2w, w2b,
                   coutw, coutb, inv_hw):
    N, C, HW = f1.shape
    mid = fcwT.shape[1]
    return pl.pallas_call(
        functools.partial(_sk_fused_kernel, inv_hw=inv_hw),
        out_shape=jax.ShapeDtypeStruct((N, C, HW), f1.dtype),
        grid=(N,),
        in_specs=[
            pl.BlockSpec((1, C, HW), lambda n: (n, 0, 0)),
            pl.BlockSpec((1, C, HW), lambda n: (n, 0, 0)),
            pl.BlockSpec((C, mid), lambda n: (0, 0)),
            pl.BlockSpec((1, mid), lambda n: (0, 0)),
            pl.BlockSpec((1, mid), lambda n: (0, 0)),
            pl.BlockSpec((C, mid), lambda n: (0, 0)),
            pl.BlockSpec((C, 1), lambda n: (0, 0)),
            pl.BlockSpec((C, mid), lambda n: (0, 0)),
            pl.BlockSpec((C, 1), lambda n: (0, 0)),
            pl.BlockSpec((C, C), lambda n: (0, 0)),
            pl.BlockSpec((C, 1), lambda n: (0, 0)),
        ],
        out_specs=pl.BlockSpec((1, C, HW), lambda n: (n, 0, 0)),
        compiler_params=pltpu.CompilerParams(
            dimension_semantics=("parallel",),
            vmem_limit_bytes=_VMEM_LIMIT),
    )(f1, f2, fcwT, fcs, fcb, w1w, w1b, w2w, w2b, coutw, coutb)


# ----------------------------------------------------------------------------
# Streaming fallback (large spatial extents): two kernels, HW tiled
# ----------------------------------------------------------------------------

def _sk_pool_attn_kernel(f1_ref, f2_ref, fcwT_ref, fcs_ref, fcb_ref,
                         w1w_ref, w1b_ref, w2w_ref, w2b_ref,
                         w1_ref, acc_ref, *, inv_hw):
    t = pl.program_id(1)

    @pl.when(t == 0)
    def _init():
        acc_ref[...] = jnp.zeros_like(acc_ref)

    tile = (f1_ref[0] + f2_ref[0]).astype(jnp.float32)           # (C, TL)
    acc_ref[...] += jnp.sum(tile, axis=-1, keepdims=True)        # (C, 1)

    @pl.when(t == pl.num_programs(1) - 1)
    def _finalize():
        s = acc_ref[...] * inv_hw
        w1_ref[0] = _attention_w1(
            s, fcwT_ref[...], fcs_ref[...], fcb_ref[...],
            w1w_ref[...], w1b_ref[...], w2w_ref[...], w2b_ref[...])


def _sk_blend_conv_kernel(f1_ref, f2_ref, w1_ref, coutw_ref, coutb_ref, o_ref):
    w1 = w1_ref[0]                                               # (C, 1)
    x1 = f1_ref[0].astype(jnp.float32)
    x2 = f2_ref[0].astype(jnp.float32)
    blended = x2 + (x1 - x2) * w1
    y = jnp.dot(coutw_ref[...], blended, preferred_element_type=jnp.float32)
    o_ref[0] = jnp.maximum(y + coutb_ref[...], 0.0).astype(o_ref.dtype)


def _sk_streaming_call(f1, f2, fcwT, fcs, fcb, w1w, w1b, w2w, w2b,
                       coutw, coutb, inv_hw):
    N, C, HW = f1.shape
    mid = fcwT.shape[1]

    # Pad HW up to a multiple of 128 so every tile is lane-dense and legal.
    # Zero padding is harmless: the pooled mean divides by the true HW, the
    # padded columns of the output are sliced off below.
    HWp = ((HW + 127) // 128) * 128
    if HWp != HW:
        pad = HWp - HW
        f1 = jnp.pad(f1, ((0, 0), (0, 0), (0, pad)))
        f2 = jnp.pad(f2, ((0, 0), (0, 0), (0, pad)))

    # Bounded tile: ~8 slab-streams (double-buffered ins/out + intermediates)
    # must fit the budget; never fall back to a full-extent block.
    max_tl = max(128, (_STREAM_BUDGET // (8 * C * 4)) // 128 * 128)
    TL = _pick_hw_tile(HWp, min(2048, max_tl))
    T = HWp // TL

    w1 = pl.pallas_call(
        functools.partial(_sk_pool_attn_kernel, inv_hw=inv_hw),
        out_shape=jax.ShapeDtypeStruct((N, C, 1), jnp.float32),
        grid=(N, T),
        in_specs=[
            pl.BlockSpec((1, C, TL), lambda n, t: (n, 0, t)),
            pl.BlockSpec((1, C, TL), lambda n, t: (n, 0, t)),
            pl.BlockSpec((C, mid), lambda n, t: (0, 0)),
            pl.BlockSpec((1, mid), lambda n, t: (0, 0)),
            pl.BlockSpec((1, mid), lambda n, t: (0, 0)),
            pl.BlockSpec((C, mid), lambda n, t: (0, 0)),
            pl.BlockSpec((C, 1), lambda n, t: (0, 0)),
            pl.BlockSpec((C, mid), lambda n, t: (0, 0)),
            pl.BlockSpec((C, 1), lambda n, t: (0, 0)),
        ],
        out_specs=pl.BlockSpec((1, C, 1), lambda n, t: (n, 0, 0)),
        scratch_shapes=[pltpu.VMEM((C, 1), jnp.float32)],
        compiler_params=pltpu.CompilerParams(
            dimension_semantics=("parallel", "arbitrary"),
            vmem_limit_bytes=_VMEM_LIMIT),
    )(f1, f2, fcwT, fcs, fcb, w1w, w1b, w2w, w2b)

    out = pl.pallas_call(
        _sk_blend_conv_kernel,
        out_shape=jax.ShapeDtypeStruct((N, C, HWp), f1.dtype),
        grid=(N, T),
        in_specs=[
            pl.BlockSpec((1, C, TL), lambda n, t: (n, 0, t)),
            pl.BlockSpec((1, C, TL), lambda n, t: (n, 0, t)),
            pl.BlockSpec((1, C, 1), lambda n, t: (n, 0, 0)),
            pl.BlockSpec((C, C), lambda n, t: (0, 0)),
            pl.BlockSpec((C, 1), lambda n, t: (0, 0)),
        ],
        out_specs=pl.BlockSpec((1, C, TL), lambda n, t: (n, 0, t)),
        compiler_params=pltpu.CompilerParams(
            dimension_semantics=("parallel", "parallel"),
            vmem_limit_bytes=_VMEM_LIMIT),
    )(f1, f2, w1, coutw, coutb)

    if HWp != HW:
        out = out[:, :, :HW]
    return out


# ----------------------------------------------------------------------------
# Forward pass (matches SK_Block.forward, eval-mode BN)
# ----------------------------------------------------------------------------

def sk_block_forward(feat1, feat2, params, force_streaming=False):
    N, C, H, W = feat1.shape
    HW = H * W
    mid = params['fc_w'].shape[0]

    # NCHW -> (N, C, H*W): pure reshape, no layout transpose, no extra HBM pass.
    f1 = feat1.reshape(N, C, HW)
    f2 = feat2.reshape(N, C, HW)

    # --- tiny constant-folded weight plumbing (all <= (C, C) tensors) ---
    fcwT = jnp.transpose(params['fc_w'])                         # (C, mid)
    fcs = params['fc_scale'].reshape(1, mid)
    fcb = params['fc_shift'].reshape(1, mid)
    w1w = params['fc1_w']                                        # (C, mid)
    w1b = params['fc1_b'].reshape(C, 1)
    w2w = params['fc2_w']
    w2b = params['fc2_b'].reshape(C, 1)
    coutw = params['cout_scale'][:, None] * params['cout_w']     # (C, C)
    coutb = params['cout_shift'].reshape(C, 1)
    inv_hw = 1.0 / float(HW)

    # Fused, VMEM-resident single pass when the per-batch slab fits (double
    # buffered inputs/output + f32 intermediates ~= 10 slabs); otherwise
    # stream with bounded tiles (keeps v7x's 32 MiB default scoped VMEM safe).
    slab_f32 = C * HW * 4
    if (not force_streaming) and (10 * slab_f32 <= _FUSED_BUDGET):
        out = _sk_fused_call(f1, f2, fcwT, fcs, fcb, w1w, w1b, w2w, w2b,
                             coutw, coutb, inv_hw)
    else:
        out = _sk_streaming_call(f1, f2, fcwT, fcs, fcb, w1w, w1b, w2w, w2b,
                                 coutw, coutb, inv_hw)
    return out.reshape(N, C, H, W)


# ----------------------------------------------------------------------------
# pure-JAX reference (eval-mode BN), for correctness checking
# ----------------------------------------------------------------------------

def sk_block_reference(feat1, feat2, params):
    hi = jax.lax.Precision.HIGHEST
    s = jnp.mean(feat1 + feat2, axis=(2, 3))                     # (N, C)
    z = jnp.dot(s, params['fc_w'].T, precision=hi)               # (N, mid)
    z = jnp.maximum(z * params['fc_scale'] + params['fc_shift'], 0.0)
    a = jnp.dot(z, params['fc1_w'].T, precision=hi) + params['fc1_b']
    b = jnp.dot(z, params['fc2_w'].T, precision=hi) + params['fc2_b']
    m = jnp.maximum(a, b)
    ea = jnp.exp(a - m)
    eb = jnp.exp(b - m)
    w1 = (ea / (ea + eb))[:, :, None, None]
    w2 = (eb / (ea + eb))[:, :, None, None]
    blended = feat1 * w1 + feat2 * w2
    y = jnp.einsum('oc,nchw->nohw', params['cout_w'], blended, precision=hi)
    y = (y * params['cout_scale'][None, :, None, None]
         + params['cout_shift'][None, :, None, None])
    return jnp.maximum(y, 0.0)


# ----------------------------------------------------------------------------
# deterministic parameter construction (PyTorch layouts, BN folded eval-mode)
# ----------------------------------------------------------------------------

def init_params(key, in_chan, mid_chan):
    ks = jax.random.split(key, 8)

    def bn(k, c):
        k1, k2, k3, k4 = jax.random.split(k, 4)
        gamma = 0.5 + jax.random.uniform(k1, (c,), jnp.float32)
        beta = 0.1 * jax.random.normal(k2, (c,), jnp.float32)
        mean = 0.1 * jax.random.normal(k3, (c,), jnp.float32)
        var = 0.5 + jax.random.uniform(k4, (c,), jnp.float32)
        return fold_bn(gamma, beta, mean, var)

    p = {}
    # sk.fc: Conv2d(in, mid, k=1, bias=False) weight[m, c] + BN(mid) + ReLU
    p['fc_w'] = 0.05 * jax.random.normal(ks[0], (mid_chan, in_chan), jnp.float32)
    p['fc_scale'], p['fc_shift'] = bn(ks[1], mid_chan)
    # sk.fc1 / sk.fc2: Linear(mid, in) with bias (PyTorch (out, in) layout)
    p['fc1_w'] = 0.05 * jax.random.normal(ks[2], (in_chan, mid_chan), jnp.float32)
    p['fc1_b'] = 0.05 * jax.random.normal(ks[3], (in_chan,), jnp.float32)
    p['fc2_w'] = 0.05 * jax.random.normal(ks[4], (in_chan, mid_chan), jnp.float32)
    p['fc2_b'] = 0.05 * jax.random.normal(ks[5], (in_chan,), jnp.float32)
    # sk.conv_out: Conv2d(in, in, k=1, bias=False) weight[o, c] + BN(in) + ReLU
    p['cout_w'] = 0.05 * jax.random.normal(ks[6], (in_chan, in_chan), jnp.float32)
    p['cout_scale'], p['cout_shift'] = bn(ks[7], in_chan)
    return p


# ----------------------------------------------------------------------------

if __name__ == "__main__":
    key = jax.random.PRNGKey(0)
    k1, k2, kp = jax.random.split(key, 3)

    N = 2
    in_chan, mid_chan = 32, 16
    H = W = 16

    feat1 = jax.random.normal(k1, (N, in_chan, H, W), jnp.float32)
    feat2 = jax.random.normal(k2, (N, in_chan, H, W), jnp.float32)
    params = init_params(kp, in_chan, mid_chan)

    fwd_fused = jax.jit(sk_block_forward)
    fwd_stream = jax.jit(functools.partial(sk_block_forward, force_streaming=True))

    out_fused = jax.block_until_ready(fwd_fused(feat1, feat2, params))
    out_stream = jax.block_until_ready(fwd_stream(feat1, feat2, params))
    ref = sk_block_reference(feat1, feat2, params)

    assert out_fused.shape == (N, in_chan, H, W)
    assert bool(jnp.all(jnp.isfinite(out_fused)))
    assert bool(jnp.allclose(out_fused, ref, rtol=5e-3, atol=5e-3))
    assert bool(jnp.allclose(out_stream, ref, rtol=5e-3, atol=5e-3))
    print("KERNEL_OK")
</pallas_src>

<mosaic_0001>
module attributes {stable_mosaic.version = 11 : i64} {
  func.func @_sk_fused_kernel(%arg0: i32, %arg1: memref<1x32x256xf32, #tpu.memory_space<vmem>>, %arg2: memref<1x32x256xf32, #tpu.memory_space<vmem>>, %arg3: memref<32x16xf32, #tpu.memory_space<vmem>>, %arg4: memref<1x16xf32, #tpu.memory_space<vmem>>, %arg5: memref<1x16xf32, #tpu.memory_space<vmem>>, %arg6: memref<32x16xf32, #tpu.memory_space<vmem>>, %arg7: memref<32x1xf32, #tpu.memory_space<vmem>>, %arg8: memref<32x16xf32, #tpu.memory_space<vmem>>, %arg9: memref<32x1xf32, #tpu.memory_space<vmem>>, %arg10: memref<32x32xf32, #tpu.memory_space<vmem>>, %arg11: memref<32x1xf32, #tpu.memory_space<vmem>>, %arg12: memref<1x32x256xf32, #tpu.memory_space<vmem>>) attributes {dimension_semantics = [#tpu.dimension_semantics<parallel>], iteration_bounds = array<i64: 2>, scalar_prefetch = 0 : i64, scratch_operands = 0 : i64, tpu.core_type = #tpu.core_type<tc>, window_params = [{transform_indices = @transform_0, window_bounds = array<i64: 1, 32, 256>}, {transform_indices = @transform_1, window_bounds = array<i64: 1, 32, 256>}, {pipeline_mode = #tpu.pipeline_mode<synchronous>, transform_indices = @transform_2, window_bounds = array<i64: 32, 16>}, {pipeline_mode = #tpu.pipeline_mode<synchronous>, transform_indices = @transform_3, window_bounds = array<i64: 1, 16>}, {pipeline_mode = #tpu.pipeline_mode<synchronous>, transform_indices = @transform_4, window_bounds = array<i64: 1, 16>}, {pipeline_mode = #tpu.pipeline_mode<synchronous>, transform_indices = @transform_5, window_bounds = array<i64: 32, 16>}, {pipeline_mode = #tpu.pipeline_mode<synchronous>, transform_indices = @transform_6, window_bounds = array<i64: 32, 1>}, {pipeline_mode = #tpu.pipeline_mode<synchronous>, transform_indices = @transform_7, window_bounds = array<i64: 32, 16>}, {pipeline_mode = #tpu.pipeline_mode<synchronous>, transform_indices = @transform_8, window_bounds = array<i64: 32, 1>}, {pipeline_mode = #tpu.pipeline_mode<synchronous>, transform_indices = @transform_9, window_bounds = array<i64: 32, 32>}, {pipeline_mode = #tpu.pipeline_mode<synchronous>, transform_indices = @transform_10, window_bounds = array<i64: 32, 1>}, {transform_indices = @transform_11, window_bounds = array<i64: 1, 32, 256>}]} {
    %c0 = arith.constant 0 : index
    %c0_0 = arith.constant 0 : index
    %c0_1 = arith.constant 0 : index
    %0 = vector.load %arg1[%c0, %c0_0, %c0_1] : memref<1x32x256xf32, #tpu.memory_space<vmem>>, vector<1x32x256xf32>
    %1 = vector.shape_cast %0 : vector<1x32x256xf32> to vector<32x256xf32>
    %c0_2 = arith.constant 0 : index
    %c0_3 = arith.constant 0 : index
    %c0_4 = arith.constant 0 : index
    %2 = vector.load %arg2[%c0_2, %c0_3, %c0_4] : memref<1x32x256xf32, #tpu.memory_space<vmem>>, vector<1x32x256xf32>
    %3 = vector.shape_cast %2 : vector<1x32x256xf32> to vector<32x256xf32>
    %4 = arith.addf %1, %3 : vector<32x256xf32>
    %cst = arith.constant dense<0.000000e+00> : vector<32xf32>
    %5 = vector.multi_reduction <add>, %4, %cst [1] : vector<32x256xf32> to vector<32xf32>
    %6 = vector.shape_cast %5 : vector<32xf32> to vector<32x1xf32>
    %cst_5 = arith.constant 3.906250e-03 : f32
    %7 = vector.broadcast %cst_5 : f32 to vector<32x1xf32>
    %8 = arith.mulf %6, %7 : vector<32x1xf32>
    %c0_6 = arith.constant 0 : index
    %c0_7 = arith.constant 0 : index
    %9 = vector.load %arg3[%c0_6, %c0_7] : memref<32x16xf32, #tpu.memory_space<vmem>>, vector<32x16xf32>
    %c0_8 = arith.constant 0 : index
    %c0_9 = arith.constant 0 : index
    %10 = vector.load %arg4[%c0_8, %c0_9] : memref<1x16xf32, #tpu.memory_space<vmem>>, vector<1x16xf32>
    %c0_10 = arith.constant 0 : index
    %c0_11 = arith.constant 0 : index
    %11 = vector.load %arg5[%c0_10, %c0_11] : memref<1x16xf32, #tpu.memory_space<vmem>>, vector<1x16xf32>
    %c0_12 = arith.constant 0 : index
    %c0_13 = arith.constant 0 : index
    %12 = vector.load %arg6[%c0_12, %c0_13] : memref<32x16xf32, #tpu.memory_space<vmem>>, vector<32x16xf32>
    %c0_14 = arith.constant 0 : index
    %c0_15 = arith.constant 0 : index
    %13 = vector.load %arg7[%c0_14, %c0_15] : memref<32x1xf32, #tpu.memory_space<vmem>>, vector<32x1xf32>
    %c0_16 = arith.constant 0 : index
    %c0_17 = arith.constant 0 : index
    %14 = vector.load %arg8[%c0_16, %c0_17] : memref<32x16xf32, #tpu.memory_space<vmem>>, vector<32x16xf32>
    %c0_18 = arith.constant 0 : index
    %c0_19 = arith.constant 0 : index
    %15 = vector.load %arg9[%c0_18, %c0_19] : memref<32x1xf32, #tpu.memory_space<vmem>>, vector<32x1xf32>
    %16 = vector.broadcast %8 : vector<32x1xf32> to vector<32x16xf32>
    %17 = arith.mulf %9, %16 : vector<32x16xf32>
    %cst_20 = arith.constant dense<0.000000e+00> : vector<16xf32>
    %18 = vector.multi_reduction <add>, %17, %cst_20 [0] : vector<32x16xf32> to vector<16xf32>
    %19 = vector.shape_cast %18 : vector<16xf32> to vector<1x16xf32>
    %20 = arith.mulf %19, %10 : vector<1x16xf32>
    %21 = arith.addf %20, %11 : vector<1x16xf32>
    %cst_21 = arith.constant 0.000000e+00 : f32
    %22 = vector.broadcast %cst_21 : f32 to vector<1x16xf32>
    %23 = arith.maximumf %21, %22 : vector<1x16xf32>
    %24 = vector.broadcast %23 : vector<1x16xf32> to vector<32x16xf32>
    %25 = arith.mulf %12, %24 : vector<32x16xf32>
    %cst_22 = arith.constant dense<0.000000e+00> : vector<32xf32>
    %26 = vector.multi_reduction <add>, %25, %cst_22 [1] : vector<32x16xf32> to vector<32xf32>
    %27 = vector.shape_cast %26 : vector<32xf32> to vector<32x1xf32>
    %28 = arith.addf %27, %13 : vector<32x1xf32>
    %29 = vector.broadcast %23 : vector<1x16xf32> to vector<32x16xf32>
    %30 = arith.mulf %14, %29 : vector<32x16xf32>
    %cst_23 = arith.constant dense<0.000000e+00> : vector<32xf32>
    %31 = vector.multi_reduction <add>, %30, %cst_23 [1] : vector<32x16xf32> to vector<32xf32>
    %32 = vector.shape_cast %31 : vector<32xf32> to vector<32x1xf32>
    %33 = arith.addf %32, %15 : vector<32x1xf32>
    %34 = arith.maximumf %28, %33 : vector<32x1xf32>
    %35 = arith.subf %28, %34 : vector<32x1xf32>
    %36 = math.exp %35 : vector<32x1xf32>
    %37 = arith.subf %33, %34 : vector<32x1xf32>
    %38 = math.exp %37 : vector<32x1xf32>
    %39 = arith.addf %36, %38 : vector<32x1xf32>
    %40 = arith.divf %36, %39 : vector<32x1xf32>
    %41 = arith.subf %1, %3 : vector<32x256xf32>
    %42 = vector.broadcast %40 : vector<32x1xf32> to vector<32x256xf32>
    %43 = arith.mulf %41, %42 : vector<32x256xf32>
    %44 = arith.addf %3, %43 : vector<32x256xf32>
    %c0_24 = arith.constant 0 : index
    %c0_25 = arith.constant 0 : index
    %45 = vector.load %arg10[%c0_24, %c0_25] : memref<32x32xf32, #tpu.memory_space<vmem>>, vector<32x32xf32>
    %cst_26 = arith.constant dense<0.000000e+00> : vector<32x256xf32>
    %46 = tpu.matmul %45, %44, %cst_26 {dimension_numbers = #tpu.dot_dimension_numbers<[1], [0], [0], [1], [0, 0, 1, 1], [], []>} : vector<32x32xf32>, vector<32x256xf32>, vector<32x256xf32> -> vector<32x256xf32>
    %c0_27 = arith.constant 0 : index
    %c0_28 = arith.constant 0 : index
    %47 = vector.load %arg11[%c0_27, %c0_28] : memref<32x1xf32, #tpu.memory_space<vmem>>, vector<32x1xf32>
    %48 = vector.broadcast %47 : vector<32x1xf32> to vector<32x256xf32>
    %49 = arith.addf %46, %48 : vector<32x256xf32>
    %cst_29 = arith.constant 0.000000e+00 : f32
    %50 = vector.broadcast %cst_29 : f32 to vector<32x256xf32>
    %51 = arith.maximumf %49, %50 : vector<32x256xf32>
    %c0_30 = arith.constant 0 : index
    %c0_31 = arith.constant 0 : index
    %c0_32 = arith.constant 0 : index
    %52 = vector.load %arg12[%c0_30, %c0_31, %c0_32] : memref<1x32x256xf32, #tpu.memory_space<vmem>>, vector<1x32x256xf32>
    %53 = vector.shape_cast %52 : vector<1x32x256xf32> to vector<32x256xf32>
    %54 = vector.shape_cast %51 : vector<32x256xf32> to vector<1x32x256xf32>
    tpu.vector_store %arg12[%c0_30, %c0_31, %c0_32], %54 {strides = array<i32>} : memref<1x32x256xf32, #tpu.memory_space<vmem>>, vector<1x32x256xf32>,
    return
  }
  func.func @transform_0(%arg0: i32) -> (i32, i32, i32) {
    %c0_i32 = arith.constant 0 : i32
    %c0_i32_0 = arith.constant 0 : i32
    %c0_i32_1 = arith.constant 0 : i32
    return %arg0, %c0_i32, %c0_i32_0 : i32, i32, i32
  }
  func.func @transform_1(%arg0: i32) -> (i32, i32, i32) {
    %c0_i32 = arith.constant 0 : i32
    %c0_i32_0 = arith.constant 0 : i32
    %c0_i32_1 = arith.constant 0 : i32
    return %arg0, %c0_i32, %c0_i32_0 : i32, i32, i32
  }
  func.func @transform_2(%arg0: i32) -> (i32, i32) {
    %c0_i32 = arith.constant 0 : i32
    %c0_i32_0 = arith.constant 0 : i32
    %c0_i32_1 = arith.constant 0 : i32
    return %c0_i32, %c0_i32_0 : i32, i32
  }
  func.func @transform_3(%arg0: i32) -> (i32, i32) {
    %c0_i32 = arith.constant 0 : i32
    %c0_i32_0 = arith.constant 0 : i32
    %c0_i32_1 = arith.constant 0 : i32
    return %c0_i32, %c0_i32_0 : i32, i32
  }
  func.func @transform_4(%arg0: i32) -> (i32, i32) {
    %c0_i32 = arith.constant 0 : i32
    %c0_i32_0 = arith.constant 0 : i32
    %c0_i32_1 = arith.constant 0 : i32
    return %c0_i32, %c0_i32_0 : i32, i32
  }
  func.func @transform_5(%arg0: i32) -> (i32, i32) {
    %c0_i32 = arith.constant 0 : i32
    %c0_i32_0 = arith.constant 0 : i32
    %c0_i32_1 = arith.constant 0 : i32
    return %c0_i32, %c0_i32_0 : i32, i32
  }
  func.func @transform_6(%arg0: i32) -> (i32, i32) {
    %c0_i32 = arith.constant 0 : i32
    %c0_i32_0 = arith.constant 0 : i32
    %c0_i32_1 = arith.constant 0 : i32
    return %c0_i32, %c0_i32_0 : i32, i32
  }
  func.func @transform_7(%arg0: i32) -> (i32, i32) {
    %c0_i32 = arith.constant 0 : i32
    %c0_i32_0 = arith.constant 0 : i32
    %c0_i32_1 = arith.constant 0 : i32
    return %c0_i32, %c0_i32_0 : i32, i32
  }
  func.func @transform_8(%arg0: i32) -> (i32, i32) {
    %c0_i32 = arith.constant 0 : i32
    %c0_i32_0 = arith.constant 0 : i32
    %c0_i32_1 = arith.constant 0 : i32
    return %c0_i32, %c0_i32_0 : i32, i32
  }
  func.func @transform_9(%arg0: i32) -> (i32, i32) {
    %c0_i32 = arith.constant 0 : i32
    %c0_i32_0 = arith.constant 0 : i32
    %c0_i32_1 = arith.constant 0 : i32
    return %c0_i32, %c0_i32_0 : i32, i32
  }
  func.func @transform_10(%arg0: i32) -> (i32, i32) {
    %c0_i32 = arith.constant 0 : i32
    %c0_i32_0 = arith.constant 0 : i32
    %c0_i32_1 = arith.constant 0 : i32
    return %c0_i32, %c0_i32_0 : i32, i32
  }
  func.func @transform_11(%arg0: i32) -> (i32, i32, i32) {
    %c0_i32 = arith.constant 0 : i32
    %c0_i32_0 = arith.constant 0 : i32
    %c0_i32_1 = arith.constant 0 : i32
    return %arg0, %c0_i32, %c0_i32_0 : i32, i32, i32
  }
}

</mosaic_0001>

<bundles_post_ra>
// kernel: sk_block_forward.1
= control target key start
LH: loop header
LB: loop body
LE: loop exit
PB: predicated region body
PF: predicated region fallthrough
CT: control target
= control target key end

     0   :  { %s986_s17 = smov 0   ;;  %s1195_s0 = inlined_call_operand.vmem [shape: f32[2,32,256], index: 0, kind: input, shape index: {}]   ;;  %s1196_s1 = inlined_call_operand.vmem [shape: f32[2,32,256], index: 1, kind: input, shape index: {}]   ;;  %s1197_s2 = inlined_call_operand.vmem [shape: f32[32,16], index: 2, kind: input, shape index: {}]   ;;  %s1198_s3 = inlined_call_operand.vmem [shape: f32[1,16], index: 3, kind: input, shape index: {}]   ;;  %s1199_s4 = inlined_call_operand.vmem [shape: f32[1,16], index: 4, kind: input, shape index: {}]   ;;  %s1200_s5 = inlined_call_operand.vmem [shape: f32[32,16], index: 5, kind: input, shape index: {}]   ;;  %s1201_s6 = inlined_call_operand.vmem [shape: f32[32,1], index: 6, kind: input, shape index: {}]   ;;  %s1202_s7 = inlined_call_operand.vmem [shape: f32[32,16], index: 7, kind: input, shape index: {}]   ;;  %s1203_s8 = inlined_call_operand.vmem [shape: f32[32,1], index: 8, kind: input, shape index: {}]   ;;  %s1204_s9 = inlined_call_operand.vmem [shape: f32[32,32], index: 9, kind: input, shape index: {}]   ;;  %s1205_s10 = inlined_call_operand.vmem [shape: f32[32,1], index: 10, kind: input, shape index: {}]   ;;  %s1206_s11 = inlined_call_operand.vmem [shape: f32[2,32,256], index: 11, kind: output, shape index: {}]  }
   0x1 LB: > { %s849_s18 = sadd.s32 4294967295, %s923_s17   ;;  %p853_p0 = scmp.ge.s32.totalorder %s923_s17, 1  ;;  %s923_s17 = sphi %s986_s17, %s21_s17  }
   0x2   : > { %p347_p1 = scmp.lt.s32.totalorder %s923_s17, 3 }
   0x4   : > { %p348_p2 = pnand %p853_p0, %p347_p1 }
   0x5   : > { %p392_p3 = scmp.lt.s32.totalorder (!%p348_p2), %s849_s18, 1 }
   0x6   : > { %351 = sbr.rel (%p348_p2) target bundleno = 612 (0x264), region = 64 }
   0xb   : > { %s1208_s18 = smov (!%p392_p3, %s849_s18), 1  ;;  %v447_v31 = vld [vmem:[%s1197_s2] sm:$0xff]  ;;  %v449_v33 = vld [vmem:[%s1197_s2 + $0x10] sm:$0xff]  ;;  %v448_v34 = vld [vmem:[%s1197_s2 + $0x8] sm:$0xff]  ;;  %vm473_vm0 = vcmask 130048  }
   0xc   : > { %s994_s19 = sshll.u32 %s1208_s18, 6  ;;  %v450_v38 = vld [vmem:[%s1197_s2 + $0x18] sm:$0xff]  ;;  %v451_v56 = vld [vmem:[%s1198_s3] sm:$0x1]  ;;  %v463_v62 = vld [vmem:[%s1202_s7 + $0x10] sm:$0xff] }
   0xd   : > { %s396_s22 = scalar_lea.vmem %s1195_s0, %s994_s19  ;;  %s401_s25 = scalar_lea.vmem %s1196_s1, %s994_s19  ;;  %v452_v58 = vld [vmem:[%s1199_s4] sm:$0x1]  ;;  %v456_v63 = vld [vmem:[%s1200_s5 + $0x18] sm:$0xff] }
   0xe   : > { %v1004_v0 = vld [vmem:[%s396_s22] sm:$0xff]  ;;  %v1006_v1 = vld [vmem:[%s396_s22 + $0x8] sm:$0xff]  ;;  %v1024_v10 = vld [vmem:[%s396_s22 + $0x10] sm:$0xff]  ;;  %s1182_s20 = scalar_lea.vmem %s1206_s11, %s994_s19 }
   0xf   : > { %v1008_v2 = vld [vmem:[%s401_s25] sm:$0xff]  ;;  %v1010_v3 = vld [vmem:[%s401_s25 + $0x8] sm:$0xff]  ;;  %v1030_v13 = vld [vmem:[%s396_s22 + $0x18] sm:$0xff] }
  0x10   : > { %v423_v4 = vadd.f32 %v1008_v2, %v1004_v0  ;;  %v1014_v5 = vld [vmem:[%s396_s22 + $0x20] sm:$0xff]  ;;  %v1016_v6 = vld [vmem:[%s396_s22 + $0x28] sm:$0xff]  ;;  %v424_v7 = vadd.f32 %v1010_v3, %v1006_v1  ;;  %v1032_v14 = vld [vmem:[%s401_s25 + $0x10] sm:$0xff] }
  0x11   : > { %v1020_v8 = vld [vmem:[%s401_s25 + $0x20] sm:$0xff]  ;;  %v1022_v9 = vld [vmem:[%s401_s25 + $0x28] sm:$0xff]  ;;  %v1034_v15 = vld [vmem:[%s401_s25 + $0x18] sm:$0xff]  ;;  %v425_v22 = vadd.f32 %v1032_v14, %v1024_v10 }
  0x12   : > { %v427_v11 = vadd.f32 %v1020_v8, %v1014_v5  ;;  %v428_v12 = vadd.f32 %v1022_v9, %v1016_v6  ;;  %v431_v16 = vadd.f32 %v424_v7, %v423_v4  ;;  %v1036_v17 = vld [vmem:[%s396_s22 + $0x30] sm:$0xff]  ;;  %v1038_v18 = vld [vmem:[%s396_s22 + $0x38] sm:$0xff]  ;;  %v426_v23 = vadd.f32 %v1034_v15, %v1030_v13 }
  0x13   : > { %v1040_v19 = vld [vmem:[%s401_s25 + $0x30] sm:$0xff]  ;;  %v1042_v21 = vld [vmem:[%s401_s25 + $0x38] sm:$0xff] }
  0x14   : > { %v437_v20 = vadd.f32 %v428_v12, %v427_v11  ;;  %432 = vadd.xlane.f32.xlu0 %v431_v16  ;;  %v429_v24 = vadd.f32 %v1040_v19, %v1036_v17  ;;  %v430_v25 = vadd.f32 %v1042_v21, %v1038_v18  ;;  %v434_v26 = vadd.f32 %v426_v23, %v425_v22  ;;  %v455_v4 = vld [vmem:[%s1200_s5 + $0x10] sm:$0xff] }
  0x16   : > { %438 = vadd.xlane.f32.xlu1 %v437_v20  ;;  %v440_v27 = vadd.f32 %v430_v25, %v429_v24  ;;  %v464_v24 = vld [vmem:[%s1202_s7 + $0x18] sm:$0xff]  ;;  %v453_v25 = vld [vmem:[%s1200_s5] sm:$0xff] }
  0x1c   : > { %435 = vadd.xlane.f32.xlu0 %v434_v26  ;;  %v462_v26 = vld [vmem:[%s1202_s7 + $0x8] sm:$0xff] }
  0x1e   : > { %441 = vadd.xlane.f32.xlu1 %v440_v27 }
  0x87   : > { %v433_v28 = vpop.xlane.xlu0 %432 }
  0x88   : > { %v443_v30 = vmul.f32 0.00390625, %v433_v28 }
  0x89   : > { %v439_v29 = vpop.xlane.xlu1 %438 }
  0x8a   : > { %v445_v32 = vmul.f32 0.00390625, %v439_v29  ;;  %v469_v36 = vmul.f32 %v447_v31, %v443_v30 }
  0x8c   : > { %v471_v41 = vmul.f32 %v449_v33, %v445_v32  ;;  %v474_v44 = vsel %vm473_vm0, %v469_v36, 0.0  ;;  %v454_v33 = vld [vmem:[%s1200_s5 + $0x8] sm:$0xff]  ;;  %v461_v36 = vld [vmem:[%s1202_s7] sm:$0xff] }
  0x8e   : > { %v477_v47 = vsel %vm473_vm0, %v471_v41, 0.0 }
  0x8f   : > { %v436_v35 = vpop.xlane.xlu0 %435 }
  0x90   : > { %v444_v37 = vmul.f32 0.00390625, %v436_v35 }
  0x91   : > { %v442_v39 = vpop.xlane.xlu1 %441 }
  0x92   : > { %v446_v40 = vmul.f32 0.00390625, %v442_v39  ;;  %v470_v42 = vmul.f32 %v448_v34, %v444_v37  ;;  %v467_v39 = vld [vmem:[%s1203_s8 + $0x10] sm:$0xff] }
  0x94   : > { %v472_v43 = vmul.f32 %v450_v38, %v446_v40  ;;  %v475_v45 = vsel %vm473_vm0, %v470_v42, 0.0  ;;  %v459_v40 = vld [vmem:[%s1201_s6 + $0x10] sm:$0xff] }
  0x95   : > { %v476_v46 = vadd.f32 %v475_v45, %v474_v44 }
  0x96   : > { %v479_v48 = vsel %vm473_vm0, %v472_v43, 0.0 }
  0x97   : > { %v478_v49 = vadd.f32 %v477_v47, %v476_v46  ;;  %v460_v47 = vld [vmem:[%s1201_s6 + $0x18] sm:$0xff] }
  0x99   : > { %v480_v50 = vadd.f32 %v479_v48, %v478_v49 }
  0x9b   : > { %v481_v51 = vrot.slane %v480_v50, 4 }
  0x9d   : > { %v482_v52 = vadd.f32 %v481_v51, %v480_v50  ;;  %v468_v50 = vld [vmem:[%s1203_s8 + $0x18] sm:$0xff]  ;;  %v925_v51 = vmov 0  }
  0x9e   : > { %891 = vset.pattern.permute.xlu1 %v925_v51  ;;  %890 = vset.pattern.permute.xlu0 %v925_v51 }
  0x9f   : > { %v483_v53 = vrot.slane %v482_v52, 2  ;;  %892 = vset.pattern.permute.xlu2 %v925_v51 }
  0xa1   : > { %v484_v54 = vadd.f32 %v483_v53, %v482_v52 }
  0xa3   : > { %v485_v55 = vrot.slane %v484_v54, 1 }
  0xa5   : > { %v486_v57 = vadd.f32 %v485_v55, %v484_v54 }
  0xa7   : > { %v487_v59 = vmul.f32 %v486_v57, %v451_v56 }
  0xa9   : > { %v488_v60 = vadd.f32 %v487_v59, %v452_v58 }
  0xab   : > { %v489_v61 = vmax.f32 %v488_v60, 0.0  ;;  %v466_v60 = vld [vmem:[%s1203_s8 + $0x8] sm:$0xff] }
  0xad   : > { %v490_v7 = vperm.slane %v489_v61, 0 }
  0xaf   : > { %v513_v11 = vmul.f32 %v490_v7, %v463_v62  ;;  %v494_v12 = vmul.f32 %v490_v7, %v456_v63  ;;  %v493_v16 = vmul.f32 %v490_v7, %v455_v4  ;;  %v514_v27 = vmul.f32 %v490_v7, %v464_v24  ;;  %v458_v62 = vld [vmem:[%s1201_s6 + $0x8] sm:$0xff] }
  0xb0   : > { %v491_v28 = vmul.f32 %v490_v7, %v453_v25  ;;  %v512_v29 = vmul.f32 %v490_v7, %v462_v26  ;;  %v492_v34 = vmul.f32 %v490_v7, %v454_v33  ;;  %v511_v37 = vmul.f32 %v490_v7, %v461_v36  ;;  %v457_v26 = vld [vmem:[%s1201_s6] sm:$0xff] }
  0xb1   : > { %v521_v20 = vsel %vm473_vm0, %v513_v11, 0.0  ;;  %v504_v22 = vsel %vm473_vm0, %v494_v12, 0.0  ;;  %v501_v23 = vsel %vm473_vm0, %v493_v16, 0.0  ;;  %v524_v30 = vsel %vm473_vm0, %v514_v27, 0.0 }
  0xb2   : > { %522 = vadd.xlane.f32.xlu1 %v521_v20  ;;  %505 = vadd.xlane.f32.xlu2 %v504_v22  ;;  %v495_v31 = vsel %vm473_vm0, %v491_v28, 0.0  ;;  %v518_v32 = vsel %vm473_vm0, %v512_v29, 0.0  ;;  %v498_v35 = vsel %vm473_vm0, %v492_v34, 0.0  ;;  %v515_v38 = vsel %vm473_vm0, %v511_v37, 0.0  ;;  %v465_v28 = vld [vmem:[%s1203_s8] sm:$0xff] }
  0xb3   : > { %502 = vadd.xlane.f32.xlu0 %v501_v23 }
  0xba   : > { %525 = vadd.xlane.f32.xlu2 %v524_v30  ;;  %496 = vadd.xlane.f32.xlu1 %v495_v31 }
  0xbb   : > { %519 = vadd.xlane.f32.xlu0 %v518_v32 }
  0xc2   : > { %499 = vadd.xlane.f32.xlu2 %v498_v35 }
  0xca   : > { %516 = vadd.xlane.f32.xlu2 %v515_v38 }
 0x125   : > { %v523_v41 = vpop.xlane.xlu1 %522  ;;  %v506_v42 = vpop.xlane.xlu2 %505 }
 0x126   : > { %v529_v43 = vadd.f32 %v523_v41, %v467_v39  ;;  %v503_v44 = vpop.xlane.xlu0 %502  ;;  %v510_v55 = vadd.f32 %v506_v42, %v460_v47 }
 0x127   : > { %v509_v45 = vadd.f32 %v503_v44, %v459_v40 }
 0x129   : > { %v533_v46 = vmax.f32 %v509_v45, %v529_v43 }
 0x12b   : > { %v537_v48 = vsub.f32 %v509_v45, %v533_v46  ;;  %v549_v49 = vsub.f32 %v529_v43, %v533_v46 }
 0x12d   : > { %v543_v52 = vmul.f32 1.442695, %v537_v48  ;;  %v555_v53 = vmul.f32 1.442695, %v549_v49  ;;  %v526_v54 = vpop.xlane.xlu2 %525  ;;  %v497_v27 = vpop.xlane.xlu1 %496 }
 0x12e   : > { %v530_v56 = vadd.f32 %v526_v54, %v468_v50  ;;  %v520_v61 = vpop.xlane.xlu0 %519  ;;  %v507_v35 = vadd.f32 %v497_v27, %v457_v26 }
 0x12f   : > { %893 = vpow2.f32 %v543_v52  ;;  %v528_v16 = vadd.f32 %v520_v61, %v466_v60 }
 0x130   : > { %895 = vpow2.f32 %v555_v53  ;;  %v534_v57 = vmax.f32 %v510_v55, %v530_v56 }
 0x132   : > { %v538_v58 = vsub.f32 %v510_v55, %v534_v57  ;;  %v550_v59 = vsub.f32 %v530_v56, %v534_v57 }
 0x134   : > { %v545_v63 = vmul.f32 1.442695, %v538_v58  ;;  %v557_v4 = vmul.f32 1.442695, %v550_v59 }
 0x135   : > { %v894_v7 = vpop.eup %893  ;;  %v500_v11 = vpop.xlane.xlu2 %499 }
 0x136   : > { %v896_v12 = vpop.eup %895  ;;  %897 = vpow2.f32 %v545_v63  ;;  %v508_v20 = vadd.f32 %v500_v11, %v458_v62 }
 0x137   : > { %v561_v22 = vadd.f32 %v896_v12, %v894_v7  ;;  %899 = vpow2.f32 %v557_v4 }
 0x138   : > { %v532_v23 = vmax.f32 %v508_v20, %v528_v16 }
 0x139   : > { %901 = vrcp.f32 %v561_v22  ;;  %v602_v43 = vand.u32 2147483647, %v561_v22  ;;  %v604_v44 = vand.u32 2147483648, %v561_v22  ;;  %vm598_vm2 = vweird.f32 %v561_v22 }
 0x13a   : > { %v536_v24 = vsub.f32 %v508_v20, %v532_v23  ;;  %v548_v25 = vsub.f32 %v528_v16, %v532_v23 }
 0x13b   : > { %v605_v53 = vor.u32 1.1754944e-38, %v604_v44  ;;  %vm603_vm4 = vcmp.eq.f32.partialorder %v602_v43, 8.507059e+37 }
 0x13c   : > { %v898_v29 = vpop.eup %897  ;;  %v541_v30 = vmul.f32 1.442695, %v536_v24  ;;  %v553_v31 = vmul.f32 1.442695, %v548_v25 }
 0x13d   : > { %v900_v32 = vpop.eup %899  ;;  %v517_v33 = vpop.xlane.xlu2 %516 }
 0x13e   : > { %v562_v34 = vadd.f32 %v900_v32, %v898_v29  ;;  %903 = vpow2.f32 %v541_v30  ;;  %v527_v36 = vadd.f32 %v517_v33, %v465_v28 }
 0x13f   : > { %v902_v37 = vpop.eup %901  ;;  %905 = vpow2.f32 %v553_v31 }
 0x140   : > { %907 = vrcp.f32 %v562_v34  ;;  %v531_v38 = vmax.f32 %v507_v35, %v527_v36  ;;  %v594_v39 = vmul.f32 %v902_v37, %v561_v22  ;;  %vm599_vm1 = vweird.f32 %v902_v37 }
 0x141   : > { %vm600_vm3 = vmor %vm598_vm2, %vm599_vm1  ;;  %v619_v59 = vand.u32 2147483648, %v562_v34  ;;  %v617_v61 = vand.u32 2147483647, %v562_v34  ;;  %vm613_vm6 = vweird.f32 %v562_v34  ;;  %vm695_vm1 = vcmask 261120  }
 0x142   : > { %v535_v40 = vsub.f32 %v507_v35, %v531_v38  ;;  %v547_v41 = vsub.f32 %v527_v36, %v531_v38  ;;  %v595_v42 = vsub.f32 1.0, %v594_v39 }
 0x143   : > { %v620_v16 = vor.u32 1.1754944e-38, %v619_v59  ;;  %vm618_vm8 = vcmp.eq.f32.partialorder %v617_v61, 8.507059e+37 }
 0x144   : > { %v904_v45 = vpop.eup %903  ;;  %v539_v46 = vmul.f32 1.442695, %v535_v40  ;;  %v551_v47 = vmul.f32 1.442695, %v547_v41  ;;  %v596_v48 = vmul.f32 %v902_v37, %v595_v42 }
 0x145   : > { %v906_v49 = vpop.eup %905 }
 0x146   : > { %v908_v50 = vpop.eup %907  ;;  %v560_v51 = vadd.f32 %v906_v49, %v904_v45  ;;  %909 = vpow2.f32 %v539_v46  ;;  %v597_v52 = vadd.f32 %v902_v37, %v596_v48  ;;  %v627_v49 = vsub.f32 %v1014_v5, %v1020_v8 }
 0x147   : > { %911 = vpow2.f32 %v551_v47  ;;  %v609_v54 = vmul.f32 %v908_v50, %v562_v34  ;;  %vm614_vm5 = vweird.f32 %v908_v50  ;;  %v672_v47 = vld [vmem:[%s1205_s10 + $0x8] sm:$0xff]  ;;  %v623_v5 = vsub.f32 %v1004_v0, %v1008_v2 }
 0x148   : > { %913 = vrcp.f32 %v560_v51  ;;  %v601_v55 = vsel %vm600_vm3, %v902_v37, %v597_v52  ;;  %vm615_vm7 = vmor %vm613_vm6, %vm614_vm5  ;;  %v589_v26 = vand.u32 2147483648, %v560_v51  ;;  %v587_v28 = vand.u32 2147483647, %v560_v51  ;;  %v673_v37 = vld [vmem:[%s1205_s10 + $0x10] sm:$0xff] }
 0x149   : > { %v606_v56 = vsel %vm603_vm4, %v605_v53, %v601_v55  ;;  %v610_v57 = vsub.f32 1.0, %v609_v54  ;;  %vm583_vm10 = vweird.f32 %v560_v51  ;;  %v628_v52 = vsub.f32 %v1016_v6, %v1022_v9 }
 0x14a   : > { %v607_v58 = vmul.f32 %v894_v7, %v606_v56  ;;  %v671_v7 = vld [vmem:[%s1205_s10] sm:$0xff]  ;;  %v590_v32 = vor.u32 1.1754944e-38, %v589_v26  ;;  %vm588_vm12 = vcmp.eq.f32.partialorder %v587_v28, 8.507059e+37  ;;  %v625_v54 = vsub.f32 %v1024_v10, %v1032_v14 }
 0x14b   : > { %v611_v60 = vmul.f32 %v908_v50, %v610_v57  ;;  %v626_v55 = vsub.f32 %v1030_v13, %v1034_v15 }
 0x14c   : > { %v910_v62 = vpop.eup %909  ;;  %643 = vperm.xlu1 %891, %v607_v58  }
 0x14d   : > { %v912_v63 = vpop.eup %911  ;;  %v612_v4 = vadd.f32 %v908_v50, %v611_v60 }
 0x14e   : > { %v914_v11 = vpop.eup %913  ;;  %v559_v12 = vadd.f32 %v912_v63, %v910_v62 }
 0x14f   : > { %v616_v20 = vsel %vm615_vm7, %v908_v50, %v612_v4  ;;  %v579_v22 = vmul.f32 %v914_v11, %v560_v51  ;;  %vm584_vm9 = vweird.f32 %v914_v11  ;;  %v629_v50 = vsub.f32 %v1036_v17, %v1040_v19 }
 0x150   : > { %915 = vrcp.f32 %v559_v12  ;;  %v621_v23 = vsel %vm618_vm8, %v620_v16, %v616_v20  ;;  %vm585_vm11 = vmor %vm583_vm10, %vm584_vm9  ;;  %v574_v39 = vand.u32 2147483648, %v559_v12  ;;  %v572_v41 = vand.u32 2147483647, %v559_v12 }
 0x151   : > { %v622_v24 = vmul.f32 %v898_v29, %v621_v23  ;;  %v580_v25 = vsub.f32 1.0, %v579_v22  ;;  %v674_v29 = vld [vmem:[%s1205_s10 + $0x18] sm:$0xff]  ;;  %vm568_vm14 = vweird.f32 %v559_v12  ;;  %v630_v51 = vsub.f32 %v1038_v18, %v1042_v21 }
 0x152   : > { %v575_v43 = vor.u32 1.1754944e-38, %v574_v39  ;;  %vm573_vm0 = vcmp.eq.f32.partialorder %v572_v41, 8.507059e+37  ;;  %v624_v18 = vsub.f32 %v1006_v1, %v1010_v3 }
 0x153   : > { %648 = vperm.xlu0 %890, %v622_v24   ;;  %v581_v27 = vmul.f32 %v914_v11, %v580_v25 }
 0x154   : > { %677 = vperm.xlu1 %891, %v671_v7  }
 0x155   : > { %v582_v30 = vadd.f32 %v914_v11, %v581_v27 }
 0x156   : > { %v916_v31 = vpop.eup %915 }
 0x157   : > { %v586_v33 = vsel %vm585_vm11, %v914_v11, %v582_v30  ;;  %v564_v34 = vmul.f32 %v916_v31, %v559_v12  ;;  %vm569_vm13 = vweird.f32 %v916_v31 }
 0x158   : > { %v591_v35 = vsel %vm588_vm12, %v590_v32, %v586_v33  ;;  %vm570_vm15 = vmor %vm568_vm14, %vm569_vm13 }
 0x159   : > { %v592_v36 = vmul.f32 %v904_v45, %v591_v35  ;;  %v565_v38 = vsub.f32 1.0, %v564_v34 }
 0x15b   : > { %692 = vperm.xlu0 %890, %v674_v29   ;;  %638 = vperm.xlu2 %892, %v592_v36   ;;  %v566_v40 = vmul.f32 %v916_v31, %v565_v38 }
 0x15c   : > { %687 = vperm.xlu1 %891, %v673_v37  }
 0x15d   : > { %v567_v42 = vadd.f32 %v916_v31, %v566_v40 }
 0x15f   : > { %v571_v44 = vsel %vm570_vm15, %v916_v31, %v567_v42 }
 0x160   : > { %v576_v46 = vsel %vm573_vm0, %v575_v43, %v571_v44 }
 0x161   : > { %v577_v45 = vmul.f32 %v910_v62, %v576_v46 }
 0x163   : > { %633 = vperm.xlu2 %892, %v577_v45  }
 0x16b   : > { %682 = vperm.xlu2 %892, %v672_v47  }
 0x1b5   : > { %v639_v48 = vpop.permute.xlu2 %638 }
 0x1b6   : > { %v653_v6 = vmul.f32 %v639_v48, %v625_v54  ;;  %v654_v62 = vmul.f32 %v639_v48, %v626_v55 }
 0x1b8   : > { %v661_v1 = vadd.f32 %v653_v6, %v1032_v14  ;;  %v669_v14 = vld [vmem:[%s1204_s9 + $0x10] sm:$0xff] }
 0x1bd   : > { %v634_v59 = vpop.permute.xlu2 %633 }
 0x1be   : > { %v644_v53 = vpop.permute.xlu1 %643  ;;  %v651_v63 = vmul.f32 %v634_v59, %v623_v5  ;;  %v652_v0 = vmul.f32 %v634_v59, %v624_v18 }
 0x1bf   : > { %v655_v57 = vmul.f32 %v644_v53, %v627_v49  ;;  %v656_v60 = vmul.f32 %v644_v53, %v628_v52 }
 0x1c1   : > { %v663_v13 = vadd.f32 %v655_v57, %v1020_v8  ;;  %v664_v4 = vadd.f32 %v656_v60, %v1022_v9  ;;  %v660_v8 = vadd.f32 %v652_v0, %v1010_v3  ;;  %v667_v9 = vld [vmem:[%s1204_s9] sm:$0xff]  ;;  %v670_v3 = vld [vmem:[%s1204_s9 + $0x18] sm:$0xff] }
 0x1c5   : > { %v649_v56 = vpop.permute.xlu0 %648  ;;  %v683_v27 = vpop.permute.xlu2 %682 }
 0x1c6   : > { %v657_v58 = vmul.f32 %v649_v56, %v629_v50  ;;  %v658_v17 = vmul.f32 %v649_v56, %v630_v51 }
 0x1c8   : > { %v665_v61 = vadd.f32 %v657_v58, %v1040_v19  ;;  %v666_v10 = vadd.f32 %v658_v17, %v1042_v21  ;;  %v662_v19 = vadd.f32 %v654_v62, %v1034_v15  ;;  %v659_v21 = vadd.f32 %v651_v63, %v1008_v2  ;;  %v668_v2 = vld [vmem:[%s1204_s9 + $0x8] sm:$0xff]  ;;  %v678_v15 = vpop.permute.xlu1 %677 }
 0x1ca   : > { %720 = vmatpush.msra.mxu0 %v665_v61  ;;  %873 = vmatpush.msra.mxu2 %v665_v61 }
 0x1cb   : > { %749 = vmatpush.msra.mxu1 %v666_v10  ;;  %877 = vmatpush.msra.mxu3 %v666_v10 }
 0x1cc   : > { %721 = vmatpush.msra.mxu0 %v663_v13  ;;  %874 = vmatpush.msra.mxu2 %v663_v13 }
 0x1cd   : > { %750 = vmatpush.msra.mxu1 %v664_v4  ;;  %878 = vmatpush.msra.mxu3 %v664_v4  ;;  %v693_v37 = vpop.permute.xlu0 %692 }
 0x1ce   : > { %722 = vmatpush.msra.mxu0 %v661_v1  ;;  %875 = vmatpush.msra.mxu2 %v661_v1 }
 0x1cf   : > { %751 = vmatpush.msra.mxu1 %v662_v19  ;;  %879 = vmatpush.msra.mxu3 %v662_v19 }
 0x1d0   : > { %723 = vmatpush.msra.mxu0 %v659_v21  ;;  %876 = vmatpush.msra.mxu2 %v659_v21  ;;  %v688_v24 = vpop.permute.xlu1 %687 }
 0x1d1   : > { %752 = vmatpush.msra.mxu1 %v660_v8  ;;  %880 = vmatpush.msra.mxu3 %v660_v8 }
 0x1d2   : > { %860 = vmatmul.msk.f32.vlgmr.msra.gmra.mxu0 %vm695_vm1, %v667_v9  ;;  %862 = vmatmul.msk.f32.vlgmr.msra.gmra.mxu2 %vm695_vm1, %v669_v14 }
 0x1d3   : > { %864 = vmatmul.msk.f32.vlgmr.msra.gmra.mxu1 %vm695_vm1, %v667_v9  ;;  %866 = vmatmul.msk.f32.vlgmr.msra.gmra.mxu3 %vm695_vm1, %v669_v14 }
 0x1da   : > { %861 = vmatmul.msk.f32.gmra.mxu0 %vm695_vm1, %v668_v2  ;;  %863 = vmatmul.msk.f32.gmra.mxu2 %vm695_vm1, %v670_v3 }
 0x1db   : > { %865 = vmatmul.msk.f32.gmra.mxu1 %vm695_vm1, %v668_v2  ;;  %867 = vmatmul.msk.f32.gmra.mxu3 %vm695_vm1, %v670_v3 }
 0x24f   : > { %v725_v11 = vpop.f32.mrf.mxu0 }
 0x250   : > { %v726_v12 = vadd.f32 %v725_v11, %v678_v15  ;;  %v754_v16 = vpop.f32.mrf.mxu1 }
 0x251   : > { %v755_v20 = vadd.f32 %v754_v16, %v678_v15 }
 0x252   : > { %v766_v22 = vmax.f32 %v726_v12, 0.0 }
 0x253   : > { %v767_v23 = vmax.f32 %v755_v20, 0.0 }
 0x254   : > { %774 = vst [vmem:[%s1182_s20] sm:$0xff] %v766_v22 }
 0x255   : > { %775 = vst [vmem:[%s1182_s20 + $0x8] sm:$0xff] %v767_v23  ;;  %v731_v7 = vpop.f32.mrf.mxu2 }
 0x256   : > { %v732_v25 = vadd.f32 %v731_v7, %v688_v24  ;;  %v760_v26 = vpop.f32.mrf.mxu3 }
 0x257   : > { %v761_v28 = vadd.f32 %v760_v26, %v688_v24  ;;  %v728_v30 = vpop.f32.mrf.mxu0 }
 0x258   : > { %v770_v31 = vmax.f32 %v732_v25, 0.0  ;;  %v729_v32 = vadd.f32 %v728_v30, %v683_v27  ;;  %v757_v33 = vpop.f32.mrf.mxu1 }
 0x259   : > { %v771_v34 = vmax.f32 %v761_v28, 0.0  ;;  %v758_v29 = vadd.f32 %v757_v33, %v683_v27 }
 0x25a   : > { %778 = vst [vmem:[%s1182_s20 + $0x20] sm:$0xff] %v770_v31  ;;  %v768_v35 = vmax.f32 %v729_v32, 0.0 }
 0x25b   : > { %779 = vst [vmem:[%s1182_s20 + $0x28] sm:$0xff] %v771_v34  ;;  %v769_v36 = vmax.f32 %v758_v29, 0.0 }
 0x25c   : > { %776 = vst [vmem:[%s1182_s20 + $0x10] sm:$0xff] %v768_v35 }
 0x25d   : > { %777 = vst [vmem:[%s1182_s20 + $0x18] sm:$0xff] %v769_v36  ;;  %v734_v38 = vpop.f32.mrf.mxu2 }
 0x25e   : > { %v735_v39 = vadd.f32 %v734_v38, %v693_v37  ;;  %v763_v40 = vpop.f32.mrf.mxu3 }
 0x25f   : > { %v764_v41 = vadd.f32 %v763_v40, %v693_v37 }
 0x260   : > { %v772_v42 = vmax.f32 %v735_v39, 0.0 }
 0x261   : > { %v773_v43 = vmax.f32 %v764_v41, 0.0 }
 0x262   : > { %780 = vst [vmem:[%s1182_s20 + $0x30] sm:$0xff] %v772_v42 }
 0x263   : > { %781 = vst [vmem:[%s1182_s20 + $0x38] sm:$0xff] %v773_v43 }
 0x264 PF: > { %s21_s17 = sadd.s32 1, %s923_s17  }
 0x265   : > { %p18_p4 = scmp.ge.s32.totalorder %s21_s17, 4  }
 0x267   :  { %20 = sbr.rel (!%p18_p4) target bundleno = 1 (0x1), region = 97 }

</bundles_post_ra>
